<compile_context>
chip_gen: v5e
topology: v5e:2x2
jax: 0.10.0
libtpu: 0.0.40
codegen_flags: <defaults>
</compile_context>

<pallas_src>
import functools

import jax
import jax.numpy as jnp
from jax.experimental import pallas as pl
from jax.experimental.pallas import tpu as pltpu

MARGIN_SP = 1.0        # nn.TripletMarginLoss() default margin
MARGIN_MG = 1.0        # assumed margin for batch_hard_triplet_loss (see TODO above)
EPS_NORM = 1e-12       # F.normalize default eps
EPS_PD = 1e-6          # F.pairwise_distance default eps (inside TripletMarginLoss)
NEG_PAD = -1e30        # padding value for extra logit columns/rows


def _round_up(x, m):
    return ((x + m - 1) // m) * m


def triplet_mgsp_kernel(pred_ref, labels_r_ref, labels_c_ref, emb_ref, out_ref, *, n_valid):
    Bp, Cp = pred_ref.shape
    Dp = emb_ref.shape[1]
    padded = (Bp != n_valid)
    inv_b = 1.0 / n_valid

    # ---- one F.normalize(dim=1) pass over the concatenated [mg; sp; pos; neg] block ----
    emb = emb_ref[...].astype(jnp.float32)                          # (4*Bp, Dp)
    sq = jnp.sum(emb * emb, axis=1, keepdims=True)                  # (4*Bp, 1)
    inv_norm = jax.lax.rsqrt(jnp.maximum(sq, EPS_NORM * EPS_NORM))  # EUP rsqrt, no divide
    emb_n = emb * inv_norm
    mg = emb_n[0 * Bp:1 * Bp, :]                                    # static, sublane-aligned slices
    sp = emb_n[1 * Bp:2 * Bp, :]
    pos = emb_n[2 * Bp:3 * Bp, :]
    neg = emb_n[3 * Bp:4 * Bp, :]

    # ---- SP triplet margin loss (p=2, margin=1.0, eps=1e-6, reduction='mean') ----
    # (zero-padded lanes only add (Dp-D)*EPS_PD^2 ~ 1e-10 to the squared distance: negligible)
    dap = sp - pos + EPS_PD
    dan = sp - neg + EPS_PD
    d_ap = jnp.sqrt(jnp.sum(dap * dap, axis=1, keepdims=True))      # (Bp,1)
    d_an = jnp.sqrt(jnp.sum(dan * dan, axis=1, keepdims=True))      # (Bp,1)
    sp_row = jnp.maximum(d_ap - d_an + MARGIN_SP, 0.0)              # (Bp,1)

    # ---- cross entropy with logits (mean over batch) ----
    logits = pred_ref[...].astype(jnp.float32)                      # (Bp,Cp); padded cols = -1e30
    labels_r = labels_r_ref[...]                                    # (Bp,1) int32; padded rows = -1
    m = jnp.max(logits, axis=1, keepdims=True)
    z = logits - m
    lse = jnp.log(jnp.sum(jnp.exp(z), axis=1, keepdims=True))
    cls_iota = jax.lax.broadcasted_iota(jnp.int32, (Bp, Cp), 1)
    onehot = cls_iota == labels_r                                   # bool (Bp,Cp)
    z_lab = jnp.sum(jnp.where(onehot, z, 0.0), axis=1, keepdims=True)
    nll = lse - z_lab                                               # (Bp,1)

    # ---- batch-hard triplet loss on normalized MG embeddings ----
    dot = jax.lax.dot_general(mg, mg, (((1,), (1,)), ((), ())),
                              preferred_element_type=jnp.float32)   # (Bp,Bp) = mg @ mg.T (MXU)
    mg_sq = mg * mg
    row_sq = jnp.sum(mg_sq, axis=1, keepdims=True)                  # (Bp,1)   lane reduction
    ones_d = jnp.ones((1, Dp), jnp.float32)
    col_sq = jax.lax.dot_general(ones_d, mg_sq, (((1,), (1,)), ((), ())),
                                 preferred_element_type=jnp.float32)  # (1,Bp) via tiny MXU matmul

    ri = jax.lax.broadcasted_iota(jnp.int32, (Bp, Bp), 0)
    ci = jax.lax.broadcasted_iota(jnp.int32, (Bp, Bp), 1)
    eye_b = ri == ci
    dist_sq = jnp.maximum(row_sq + col_sq - 2.0 * dot, 0.0)
    dist_sq = jnp.where(eye_b, 0.0, dist_sq)                        # exact-zero diagonal
    dist = jnp.sqrt(dist_sq)                                        # (Bp,Bp)

    labels_c = labels_c_ref[...]                                    # (1,Bp) int32
    same_b = labels_r == labels_c                                   # (Bp,Bp) bool
    pos_b = jnp.logical_and(same_b, jnp.logical_not(eye_b))
    if padded:
        col_valid = ci < n_valid
        pos_b = jnp.logical_and(pos_b, col_valid)
    hardest_pos = jnp.max(jnp.where(pos_b, dist, 0.0), axis=1, keepdims=True)   # (Bp,1)

    if padded:
        dist_for_max = jnp.where(col_valid, dist, 0.0)
    else:
        dist_for_max = dist
    max_dist = jnp.max(dist_for_max, axis=1, keepdims=True)                      # (Bp,1)
    neg_cand = jnp.where(same_b, dist + max_dist, dist)
    if padded:
        neg_cand = jnp.where(col_valid, neg_cand, jnp.float32(3.0e38))
    hardest_neg = jnp.min(neg_cand, axis=1, keepdims=True)                       # (Bp,1)
    tl = jnp.maximum(hardest_pos - hardest_neg + MARGIN_MG, 0.0)                 # (Bp,1)

    # ---- combine (alpha = beta = gamma = 1): single masked sum, one multiply by 1/B ----
    per_row = nll + tl + sp_row                                                  # (Bp,1)
    if padded:
        row_valid = jax.lax.broadcasted_iota(jnp.int32, (Bp, 1), 0) < n_valid
        per_row = jnp.where(row_valid, per_row, 0.0)
    out_ref[...] = jnp.sum(per_row, axis=0, keepdims=True) * inv_b               # (1,1)


def triplet_mgsp_loss(pred_class, labels, MG_embedding, SP_embeddings,
                      positive_SP_emb, negative_SP_emb):
    B, C = pred_class.shape
    D = MG_embedding.shape[1]
    Bp = _round_up(B, 8)       # sublane-dense batch
    Cp = _round_up(C, 128)     # lane-dense logits
    Dp = _round_up(D, 128)     # lane-dense embeddings

    # logits: pad extra classes / rows with a large negative (exp underflows to exactly 0)
    pred = jnp.pad(pred_class.astype(jnp.float32),
                   ((0, Bp - B), (0, Cp - C)), constant_values=NEG_PAD)

    # labels: pad with -1 (never matches a real class / real label)
    labels_i = jnp.pad(labels.astype(jnp.int32), (0, Bp - B), constant_values=-1)
    labels_r = labels_i.reshape(Bp, 1)
    labels_c = labels_i.reshape(1, Bp)

    # single concatenated embedding block [mg; sp; pos; neg]  -> one DMA, one normalize pass
    def prep(e):
        return jnp.pad(e.astype(jnp.float32), ((0, Bp - B), (0, Dp - D)))
    emb = jnp.concatenate([prep(MG_embedding), prep(SP_embeddings),
                           prep(positive_SP_emb), prep(negative_SP_emb)], axis=0)  # (4*Bp, Dp)

    vmem = pl.BlockSpec(memory_space=pltpu.MemorySpace.VMEM)
    out = pl.pallas_call(
        functools.partial(triplet_mgsp_kernel, n_valid=B),
        out_shape=jax.ShapeDtypeStruct((1, 1), jnp.float32),
        in_specs=[vmem, vmem, vmem, vmem],
        out_specs=vmem,
    )(pred, labels_r, labels_c, emb)
    return out[0, 0]


def reference_loss(pred, labels, mg, sp, pos, neg):
    """Pure-JAX reference matching the PyTorch forward semantics."""
    def norm(x):
        return x / jnp.maximum(jnp.linalg.norm(x, axis=1, keepdims=True), EPS_NORM)
    mg, sp, pos, neg = norm(mg), norm(sp), norm(pos), norm(neg)
    d_ap = jnp.linalg.norm(sp - pos + EPS_PD, axis=1)
    d_an = jnp.linalg.norm(sp - neg + EPS_PD, axis=1)
    sp_loss = jnp.mean(jnp.maximum(d_ap - d_an + MARGIN_SP, 0.0))
    logp = jax.nn.log_softmax(pred, axis=1)
    ce = -jnp.mean(logp[jnp.arange(pred.shape[0]), labels])
    dot = mg @ mg.T
    sq = jnp.diag(dot)
    d2 = jnp.maximum(sq[None, :] - 2.0 * dot + sq[:, None], 0.0)
    dist = jnp.sqrt(d2)
    same = (labels[:, None] == labels[None, :]).astype(jnp.float32)
    eye = jnp.eye(labels.shape[0], dtype=jnp.float32)
    hp = jnp.max(same * (1.0 - eye) * dist, axis=1)
    md = jnp.max(dist, axis=1)
    hn = jnp.min(dist + md[:, None] * same, axis=1)
    mg_loss = jnp.mean(jnp.maximum(hp - hn + MARGIN_MG, 0.0))
    return ce + mg_loss + sp_loss


if __name__ == "__main__":
    key = jax.random.PRNGKey(0)
    B, C, D = 8, 4, 32
    k1, k2, k3, k4, k5, k6 = jax.random.split(key, 6)
    pred = jax.random.normal(k1, (B, C), jnp.float32)
    labels = jax.random.randint(k2, (B,), 0, C, jnp.int32)
    mg = jax.random.normal(k3, (B, D), jnp.float32)
    sp = jax.random.normal(k4, (B, D), jnp.float32)
    pos = jax.random.normal(k5, (B, D), jnp.float32)
    neg = jax.random.normal(k6, (B, D), jnp.float32)

    out = triplet_mgsp_loss(pred, labels, mg, sp, pos, neg)
    out = jax.block_until_ready(out)

    ref = reference_loss(pred, labels, mg, sp, pos, neg)
    assert jnp.allclose(out, ref, rtol=1e-4, atol=1e-5), (out, ref)
    print("KERNEL_OK")
</pallas_src>

<mosaic_0001>
module attributes {stable_mosaic.version = 11 : i64} {
  func.func @triplet_mgsp_kernel(%arg0: memref<8x128xf32, #tpu.memory_space<vmem>>, %arg1: memref<8x1xi32, #tpu.memory_space<vmem>>, %arg2: memref<1x8xi32, #tpu.memory_space<vmem>>, %arg3: memref<32x128xf32, #tpu.memory_space<vmem>>, %arg4: memref<1x1xf32, #tpu.memory_space<vmem>>) attributes {dimension_semantics = [], scalar_prefetch = 0 : i64, scratch_operands = 0 : i64, tpu.core_type = #tpu.core_type<tc>} {
    %c0 = arith.constant 0 : index
    %c0_0 = arith.constant 0 : index
    %0 = vector.load %arg3[%c0, %c0_0] : memref<32x128xf32, #tpu.memory_space<vmem>>, vector<32x128xf32>
    %1 = arith.mulf %0, %0 : vector<32x128xf32>
    %cst = arith.constant dense<0.000000e+00> : vector<32xf32>
    %2 = vector.multi_reduction <add>, %1, %cst [1] : vector<32x128xf32> to vector<32xf32>
    %3 = vector.shape_cast %2 : vector<32xf32> to vector<32x1xf32>
    %cst_1 = arith.constant 1.000000e-24 : f32
    %4 = vector.broadcast %cst_1 : f32 to vector<32x1xf32>
    %5 = arith.maximumf %3, %4 : vector<32x1xf32>
    %6 = math.rsqrt %5 : vector<32x1xf32>
    %7 = vector.broadcast %6 : vector<32x1xf32> to vector<32x128xf32>
    %8 = arith.mulf %0, %7 : vector<32x128xf32>
    %9 = vector.extract_strided_slice %8 {offsets = [0, 0], sizes = [8, 128], strides = [1, 1]} : vector<32x128xf32> to vector<8x128xf32>
    %10 = vector.extract_strided_slice %8 {offsets = [8, 0], sizes = [8, 128], strides = [1, 1]} : vector<32x128xf32> to vector<8x128xf32>
    %11 = vector.extract_strided_slice %8 {offsets = [16, 0], sizes = [8, 128], strides = [1, 1]} : vector<32x128xf32> to vector<8x128xf32>
    %12 = vector.extract_strided_slice %8 {offsets = [24, 0], sizes = [8, 128], strides = [1, 1]} : vector<32x128xf32> to vector<8x128xf32>
    %13 = arith.subf %10, %11 : vector<8x128xf32>
    %cst_2 = arith.constant 9.99999997E-7 : f32
    %14 = vector.broadcast %cst_2 : f32 to vector<8x128xf32>
    %15 = arith.addf %13, %14 : vector<8x128xf32>
    %16 = arith.subf %10, %12 : vector<8x128xf32>
    %cst_3 = arith.constant 9.99999997E-7 : f32
    %17 = vector.broadcast %cst_3 : f32 to vector<8x128xf32>
    %18 = arith.addf %16, %17 : vector<8x128xf32>
    %19 = arith.mulf %15, %15 : vector<8x128xf32>
    %cst_4 = arith.constant dense<0.000000e+00> : vector<8xf32>
    %20 = vector.multi_reduction <add>, %19, %cst_4 [1] : vector<8x128xf32> to vector<8xf32>
    %21 = vector.shape_cast %20 : vector<8xf32> to vector<8x1xf32>
    %22 = math.sqrt %21 : vector<8x1xf32>
    %23 = arith.mulf %18, %18 : vector<8x128xf32>
    %cst_5 = arith.constant dense<0.000000e+00> : vector<8xf32>
    %24 = vector.multi_reduction <add>, %23, %cst_5 [1] : vector<8x128xf32> to vector<8xf32>
    %25 = vector.shape_cast %24 : vector<8xf32> to vector<8x1xf32>
    %26 = math.sqrt %25 : vector<8x1xf32>
    %27 = arith.subf %22, %26 : vector<8x1xf32>
    %cst_6 = arith.constant 1.000000e+00 : f32
    %28 = vector.broadcast %cst_6 : f32 to vector<8x1xf32>
    %29 = arith.addf %27, %28 : vector<8x1xf32>
    %cst_7 = arith.constant 0.000000e+00 : f32
    %30 = vector.broadcast %cst_7 : f32 to vector<8x1xf32>
    %31 = arith.maximumf %29, %30 : vector<8x1xf32>
    %c0_8 = arith.constant 0 : index
    %c0_9 = arith.constant 0 : index
    %32 = vector.load %arg0[%c0_8, %c0_9] : memref<8x128xf32, #tpu.memory_space<vmem>>, vector<8x128xf32>
    %c0_10 = arith.constant 0 : index
    %c0_11 = arith.constant 0 : index
    %33 = vector.load %arg1[%c0_10, %c0_11] : memref<8x1xi32, #tpu.memory_space<vmem>>, vector<8x1xi32>
    %cst_12 = arith.constant dense<0xFF800000> : vector<8xf32>
    %34 = vector.multi_reduction <maximumf>, %32, %cst_12 [1] : vector<8x128xf32> to vector<8xf32>
    %35 = vector.shape_cast %34 : vector<8xf32> to vector<8x1xf32>
    %36 = vector.broadcast %35 : vector<8x1xf32> to vector<8x128xf32>
    %37 = arith.subf %32, %36 : vector<8x128xf32>
    %38 = math.exp %37 : vector<8x128xf32>
    %cst_13 = arith.constant dense<0.000000e+00> : vector<8xf32>
    %39 = vector.multi_reduction <add>, %38, %cst_13 [1] : vector<8x128xf32> to vector<8xf32>
    %40 = vector.shape_cast %39 : vector<8xf32> to vector<8x1xf32>
    %41 = math.log %40 : vector<8x1xf32>
    %42 = tpu.iota {dimensions = array<i32: 1>} : vector<8x128xi32>
    %43 = vector.broadcast %33 : vector<8x1xi32> to vector<8x128xi32>
    %44 = arith.cmpi eq, %42, %43 : vector<8x128xi32>
    %cst_14 = arith.constant 0.000000e+00 : f32
    %45 = vector.broadcast %cst_14 : f32 to vector<8x128xf32>
    %46 = arith.select %44, %37, %45 : vector<8x128xi1>, vector<8x128xf32>
    %cst_15 = arith.constant dense<0.000000e+00> : vector<8xf32>
    %47 = vector.multi_reduction <add>, %46, %cst_15 [1] : vector<8x128xf32> to vector<8xf32>
    %48 = vector.shape_cast %47 : vector<8xf32> to vector<8x1xf32>
    %49 = arith.subf %41, %48 : vector<8x1xf32>
    %cst_16 = arith.constant dense<0.000000e+00> : vector<8x8xf32>
    %50 = tpu.matmul %9, %9, %cst_16 {dimension_numbers = #tpu.dot_dimension_numbers<[1], [1], [0], [0], [0, 0, 1, 0], [], []>} : vector<8x128xf32>, vector<8x128xf32>, vector<8x8xf32> -> vector<8x8xf32>
    %51 = arith.mulf %9, %9 : vector<8x128xf32>
    %cst_17 = arith.constant dense<0.000000e+00> : vector<8xf32>
    %52 = vector.multi_reduction <add>, %51, %cst_17 [1] : vector<8x128xf32> to vector<8xf32>
    %53 = vector.shape_cast %52 : vector<8xf32> to vector<8x1xf32>
    %cst_18 = arith.constant 1.000000e+00 : f32
    %54 = vector.broadcast %cst_18 : f32 to vector<1x128xf32>
    %cst_19 = arith.constant dense<0.000000e+00> : vector<1x8xf32>
    %55 = tpu.matmul %54, %51, %cst_19 {dimension_numbers = #tpu.dot_dimension_numbers<[1], [1], [0], [0], [0, 0, 1, 0], [], []>} : vector<1x128xf32>, vector<8x128xf32>, vector<1x8xf32> -> vector<1x8xf32>
    %56 = tpu.iota {dimensions = array<i32: 0>} : vector<8x8xi32>
    %57 = tpu.iota {dimensions = array<i32: 1>} : vector<8x8xi32>
    %58 = arith.cmpi eq, %56, %57 : vector<8x8xi32>
    %59 = vector.broadcast %53 : vector<8x1xf32> to vector<8x8xf32>
    %60 = vector.broadcast %55 : vector<1x8xf32> to vector<8x8xf32>
    %61 = arith.addf %59, %60 : vector<8x8xf32>
    %cst_20 = arith.constant 2.000000e+00 : f32
    %62 = vector.broadcast %cst_20 : f32 to vector<8x8xf32>
    %63 = arith.mulf %62, %50 : vector<8x8xf32>
    %64 = arith.subf %61, %63 : vector<8x8xf32>
    %cst_21 = arith.constant 0.000000e+00 : f32
    %65 = vector.broadcast %cst_21 : f32 to vector<8x8xf32>
    %66 = arith.maximumf %64, %65 : vector<8x8xf32>
    %cst_22 = arith.constant 0.000000e+00 : f32
    %67 = vector.broadcast %cst_22 : f32 to vector<8x8xf32>
    %68 = arith.select %58, %67, %66 : vector<8x8xi1>, vector<8x8xf32>
    %69 = math.sqrt %68 : vector<8x8xf32>
    %c0_23 = arith.constant 0 : index
    %c0_24 = arith.constant 0 : index
    %70 = vector.load %arg2[%c0_23, %c0_24] : memref<1x8xi32, #tpu.memory_space<vmem>>, vector<1x8xi32>
    %71 = vector.broadcast %33 : vector<8x1xi32> to vector<8x8xi32>
    %72 = vector.broadcast %70 : vector<1x8xi32> to vector<8x8xi32>
    %73 = arith.cmpi eq, %71, %72 : vector<8x8xi32>
    %cst_25 = arith.constant dense<true> : vector<8x8xi1>
    %74 = arith.xori %58, %cst_25 : vector<8x8xi1>
    %75 = arith.andi %73, %74 : vector<8x8xi1>
    %cst_26 = arith.constant 0.000000e+00 : f32
    %76 = vector.broadcast %cst_26 : f32 to vector<8x8xf32>
    %77 = arith.select %75, %69, %76 : vector<8x8xi1>, vector<8x8xf32>
    %cst_27 = arith.constant dense<0xFF800000> : vector<8xf32>
    %78 = vector.multi_reduction <maximumf>, %77, %cst_27 [1] : vector<8x8xf32> to vector<8xf32>
    %79 = vector.shape_cast %78 : vector<8xf32> to vector<8x1xf32>
    %cst_28 = arith.constant dense<0xFF800000> : vector<8xf32>
    %80 = vector.multi_reduction <maximumf>, %69, %cst_28 [1] : vector<8x8xf32> to vector<8xf32>
    %81 = vector.shape_cast %80 : vector<8xf32> to vector<8x1xf32>
    %82 = vector.broadcast %81 : vector<8x1xf32> to vector<8x8xf32>
    %83 = arith.addf %69, %82 : vector<8x8xf32>
    %84 = arith.select %73, %83, %69 : vector<8x8xi1>, vector<8x8xf32>
    %cst_29 = arith.constant dense<0x7F800000> : vector<8xf32>
    %85 = vector.multi_reduction <minimumf>, %84, %cst_29 [1] : vector<8x8xf32> to vector<8xf32>
    %86 = vector.shape_cast %85 : vector<8xf32> to vector<8x1xf32>
    %87 = arith.subf %79, %86 : vector<8x1xf32>
    %cst_30 = arith.constant 1.000000e+00 : f32
    %88 = vector.broadcast %cst_30 : f32 to vector<8x1xf32>
    %89 = arith.addf %87, %88 : vector<8x1xf32>
    %cst_31 = arith.constant 0.000000e+00 : f32
    %90 = vector.broadcast %cst_31 : f32 to vector<8x1xf32>
    %91 = arith.maximumf %89, %90 : vector<8x1xf32>
    %92 = arith.addf %49, %91 : vector<8x1xf32>
    %93 = arith.addf %92, %31 : vector<8x1xf32>
    %cst_32 = arith.constant dense<0.000000e+00> : vector<1xf32>
    %94 = vector.multi_reduction <add>, %93, %cst_32 [0] : vector<8x1xf32> to vector<1xf32>
    %95 = vector.shape_cast %94 : vector<1xf32> to vector<1x1xf32>
    %cst_33 = arith.constant 1.250000e-01 : f32
    %96 = vector.broadcast %cst_33 : f32 to vector<1x1xf32>
    %97 = arith.mulf %95, %96 : vector<1x1xf32>
    %c0_34 = arith.constant 0 : index
    %c0_35 = arith.constant 0 : index
    %98 = vector.load %arg4[%c0_34, %c0_35] : memref<1x1xf32, #tpu.memory_space<vmem>>, vector<1x1xf32>
    tpu.vector_store %arg4[%c0_34, %c0_35], %97 {strides = array<i32>} : memref<1x1xf32, #tpu.memory_space<vmem>>, vector<1x1xf32>,
    return
  }
}

</mosaic_0001>

<bundles_post_ra>
// kernel: tpu_custom_call.1
= control target key start
LH: loop header
LB: loop body
LE: loop exit
PB: predicated region body
PF: predicated region fallthrough
CT: control target
= control target key end

     0   :  { %9 = vsyncpa [#allocation3], 0  ;;  %s428_s0 = inlined_call_operand.vmem [shape: f32[8,128], index: 0, kind: input, shape index: {}]   ;;  %s429_s1 = inlined_call_operand.vmem [shape: s32[8,1], index: 1, kind: input, shape index: {}]   ;;  %s430_s2 = inlined_call_operand.vmem [shape: s32[1,8], index: 2, kind: input, shape index: {}]   ;;  %s431_s3 = inlined_call_operand.hbm [shape: f32[32,128], index: 3, kind: input, shape index: {}]   ;;  %s432_s4 = inlined_call_operand.hbm [shape: f32[1,1], index: 4, kind: output, shape index: {}]  }
   0x1   :  { %10 = vsyncpa [#allocation4], 0  ;;  %s21_s17 = sshll.u32 %s431_s3, 4  ;;  %s349_s18 = smov [#allocation2]   ;;  %s22_s17 = int_to_ptr.hbm [resolvable:$true] %s21_s17 }
   0x2   :  { %s23_s19 = sshll.u32 %s349_s18, 4  ;;  %s350_s20 = smov 128   ;;  %s24_s19 = int_to_ptr.vmem [resolvable:$true] %s23_s19 }
   0x3   :  { %s351_s21 = smov 8  }
   0x4   :  { %29 = dma.hbm_to_vmem [thread:$0]  %s22_s17, 512, %s24_s19, [#allocation3], %s350_s20, %s350_s20, %s351_s21  }
   0x5   :  { %345 = dma.done.wait [#allocation3], 512  }
   0x6   :  { %346 = vsyncadd [#allocation3], 4294966784  ;;  %v34_v0 = vld [vmem:[#allocation2] sm:$0xff]  ;;  %v384_v2 = vld [vmem:[#allocation2 + $0x8] sm:$0xff]  ;;  %v352_v6 = vmov 0   ;;  %v353_v20 = vmov 1.0   ;;  %v146_v33 = vlaneseq }
   0x7   :  { %v38_v1 = vmul.f32 %v34_v0, %v34_v0  ;;  %v386_v3 = vld [vmem:[#allocation2 + $0x18] sm:$0xff]  ;;  %v39_v4 = vmul.f32 %v384_v2, %v384_v2  ;;  %276 = vset.pattern.permute.xlu1 %v352_v6  ;;  %277 = vset.pattern.permute.xlu0 %v352_v6  ;;  %v392_v8 = vld [vmem:[#allocation2 + $0x10] sm:$0xff]  ;;  %v136_v21 = vld [vmem:[%s429_s1] sm:$0xff]  ;;  %vm226_vm14 = vcmask 64512   ;;  %s259_s28 = sshll.u32 %s432_s4, 4  ;;  %s260_s28 = int_to_ptr.hbm [resolvable:$true] %s259_s28 }
   0x8   :  { %v41_v5 = vmul.f32 %v386_v3, %v386_v3  ;;  %v40_v10 = vmul.f32 %v392_v8, %v392_v8  ;;  %v402_v22 = vld [vmem:[%s428_s0] sm:$0xff]  ;;  %v405_v41 = vand.u32 127, %v146_v33  ;;  %v200_v42 = vshrl.u32 %v146_v33, 7 }
   0x9   :  { %42 = vadd.xlane.f32.xlu0 %v38_v1  ;;  %44 = vadd.xlane.f32.xlu1 %v39_v4 }
   0xa   :  { %48 = vadd.xlane.f32.xlu2 %v41_v5  ;;  %vm201_vm3 = vcmp.eq.s32.totalorder %v200_v42, %v405_v41 }
  0x11   :  { %46 = vadd.xlane.f32.xlu1 %v40_v10 }
  0x12   :  { %137 = vmax.xlane.f32.xlu2 %v402_v22 }
  0x2a   :  { %149 = vperm.xlu1 %276, %v136_v21  }
  0x7c   :  { %v43_v7 = vpop.xlane.xlu0 %42  ;;  %v45_v23 = vpop.xlane.xlu1 %44 }
  0x7d   :  { %v50_v9 = vmax.f32 %v43_v7, 1e-24  ;;  %v51_v24 = vmax.f32 %v45_v23, 1e-24  ;;  %v49_v25 = vpop.xlane.xlu2 %48 }
  0x7e   :  { %v53_v28 = vmax.f32 %v49_v25, 1e-24 }
  0x7f   :  { %279 = vrsqrt.f32 %v50_v9  ;;  %vm60_vm1 = vweird.f32 %v50_v9  ;;  %vm70_vm4 = vweird.f32 %v51_v24 }
  0x80   :  { %281 = vrsqrt.f32 %v51_v24  ;;  %vm90_vm9 = vweird.f32 %v53_v28 }
  0x84   :  { %v47_v26 = vpop.xlane.xlu1 %46 }
  0x85   :  { %v280_v11 = vpop.eup %279  ;;  %v52_v27 = vmax.f32 %v47_v26, 1e-24  ;;  %v138_v23 = vpop.xlane.xlu2 %137 }
  0x86   :  { %v55_v12 = vmul.f32 %v280_v11, %v50_v9  ;;  %vm61_vm0 = vweird.f32 %v280_v11  ;;  %v282_v29 = vpop.eup %281 }
  0x87   :  { %vm62_vm2 = vmor %vm60_vm1, %vm61_vm0  ;;  %283 = vrsqrt.f32 %v52_v27  ;;  %v65_v30 = vmul.f32 %v282_v29, %v51_v24  ;;  %vm71_vm5 = vweird.f32 %v282_v29  ;;  %vm80_vm6 = vweird.f32 %v52_v27 }
  0x88   :  { %v56_v13 = vmul.f32 %v280_v11, %v55_v12  ;;  %285 = vrsqrt.f32 %v53_v28  ;;  %vm72_vm8 = vmor %vm70_vm4, %vm71_vm5  ;;  %vm354_vm0 = vmmov 1   ;;  %v139_v24 = vsub.f32 %v402_v22, %v138_v23 }
  0x89   :  { %v66_v36 = vmul.f32 %v282_v29, %v65_v30  ;;  %vm223_vm1 = vmxor %vm201_vm3, %vm354_vm0 }
  0x8a   :  { %v57_v14 = vmul.f32 0.5, %v56_v13  ;;  %v140_v25 = vmul.f32 1.442695, %v139_v24 }
  0x8b   :  { %v67_v45 = vmul.f32 0.5, %v66_v36 }
  0x8c   :  { %v58_v15 = vsub.f32 1.5, %v57_v14 }
  0x8d   :  { %v284_v31 = vpop.eup %283  ;;  %v68_v50 = vsub.f32 1.5, %v67_v45 }
  0x8e   :  { %v59_v16 = vmul.f32 %v280_v11, %v58_v15  ;;  %v286_v32 = vpop.eup %285  ;;  %v75_v37 = vmul.f32 %v284_v31, %v52_v27  ;;  %vm81_vm7 = vweird.f32 %v284_v31 }
  0x8f   :  { %v85_v39 = vmul.f32 %v286_v32, %v53_v28  ;;  %v69_v55 = vmul.f32 %v282_v29, %v68_v50  ;;  %vm91_vm10 = vweird.f32 %v286_v32  ;;  %vm82_vm11 = vmor %vm80_vm6, %vm81_vm7 }
  0x90   :  { %v63_v17 = vsel %vm62_vm2, %v280_v11, %v59_v16  ;;  %v76_v46 = vmul.f32 %v284_v31, %v75_v37  ;;  %vm92_vm12 = vmor %vm90_vm9, %vm91_vm10  ;;  %vm250_vm9 = vcmask 0  }
  0x91   :  { %v94_v18 = vmul.f32 %v63_v17, %v34_v0  ;;  %v86_v48 = vmul.f32 %v286_v32, %v85_v39  ;;  %v73_v58 = vsel %vm72_vm8, %v282_v29, %v69_v55 }
  0x92   :  { %v77_v51 = vmul.f32 0.5, %v76_v46  ;;  %v95_v0 = vmul.f32 %v73_v58, %v384_v2 }
  0x93   :  { %171 = vmatpush.xpose.msra.mxu0 %v94_v18  ;;  %v176_v19 = vmul.f32 %v94_v18, %v94_v18  ;;  %v87_v52 = vmul.f32 0.5, %v86_v48 }
  0x94   :  { %v78_v54 = vsub.f32 1.5, %v77_v51 }
  0x95   :  { %177 = vadd.xlane.f32.xlu0 %v176_v19  ;;  %194 = vmatpush.xpose.msra.mxu1 %v176_v19  ;;  %v88_v56 = vsub.f32 1.5, %v87_v52 }
  0x96   :  { %172 = vmatmul.f32.vlgmr.msra.gmra.mxu0 %v94_v18  ;;  %v79_v59 = vmul.f32 %v284_v31, %v78_v54  ;;  %v278_v18 = vld [vmem:[%s430_s2] ss:$0 sm:$0xff]  ;;  %s355_s2 = smov [#allocation5]  }
  0x97   :  { %v89_v61 = vmul.f32 %v286_v32, %v88_v56  ;;  %s257_s25 = sshll.u32 %s355_s2, 4  ;;  %s258_s25 = int_to_ptr.vmem [resolvable:$true] %s257_s25 }
  0x98   :  { %195 = vmatmul.f32.vlgmr.msra.gmra.mxu1 %v353_v20  ;;  %v83_v62 = vsel %vm82_vm11, %v284_v31, %v79_v59 }
  0x99   :  { %v96_v1 = vmul.f32 %v83_v62, %v392_v8  ;;  %v93_v5 = vsel %vm92_vm12, %v286_v32, %v89_v61 }
  0x9a   :  { %v97_v10 = vmul.f32 %v93_v5, %v386_v3 }
  0x9b   :  { %v98_v6 = vsub.f32 %v95_v0, %v96_v1 }
  0x9c   :  { %v100_v15 = vsub.f32 %v95_v0, %v97_v10  ;;  %v150_v3 = vpop.permute.xlu1 %149 }
  0x9d   :  { %v99_v9 = vadd.f32 1e-06, %v98_v6  ;;  %vm222_vm2 = vcmp.eq.s32.totalorder %v150_v3, %v278_v18  ;;  %vm151_vm5 = vcmp.eq.s32.totalorder %v405_v41, %v150_v3 }
  0x9e   :  { %v101_v17 = vadd.f32 1e-06, %v100_v15  ;;  %vm224_vm4 = vmand %vm222_vm2, %vm223_vm1  ;;  %v152_v26 = vsel %vm151_vm5, %v139_v24, 0.0 }
  0x9f   :  { %v102_v12 = vmul.f32 %v99_v9, %v99_v9 }
  0xa0   :  { %v117_v19 = vmul.f32 %v101_v17, %v101_v17 }
  0xa1   :  { %103 = vadd.xlane.f32.xlu2 %v102_v12 }
 0x108   :  { %v178_v40 = vpop.xlane.xlu0 %177 }
 0x113   :  { %v173_v34 = vpop.f32.mrf.mxu0 }
 0x114   :  { %v204_v43 = vmul.f32 2.0, %v173_v34  ;;  %v104_v32 = vpop.xlane.xlu2 %103 }
 0x115   :  { %v196_v35 = vpop.f32.mrf.mxu1  ;;  %v115_v48 = vand.u32 2147483648, %v104_v32  ;;  %vm114_vm7 = vcmp.eq.f32.partialorder %v104_v32, 0.0 }
 0x116   :  { %v202_v38 = vperm.slane %v196_v35, 0 }
 0x118   :  { %v203_v44 = vadd.f32 %v202_v38, %v178_v40 }
 0x11a   :  { %v205_v47 = vsub.f32 %v203_v44, %v204_v43 }
 0x11c   :  { %v206_v49 = vmax.f32 %v205_v47, 0.0 }
 0x11e   :  { %v207_v53 = vsel %vm201_vm3, 0.0, %v206_v49  ;;  %vm112_vm3 = vcmp.eq.f32.partialorder %v104_v32, inf }
 0x11f   :  { %287 = vrsqrt.f32 %v207_v53  ;;  %vm215_vm13 = vcmp.eq.f32.partialorder %v207_v53, inf  ;;  %v218_v14 = vand.u32 2147483648, %v207_v53  ;;  %vm217_vm15 = vcmp.eq.f32.partialorder %v207_v53, 0.0 }
 0x120   :  { %289 = vpow2.f32 %v140_v25 }
 0x121   :  { %291 = vrsqrt.f32 %v104_v32 }
 0x125   :  { %v288_v57 = vpop.eup %287 }
 0x126   :  { %v209_v60 = vmul.f32 %v288_v57, %v207_v53  ;;  %v290_v27 = vpop.eup %289 }
 0x127   :  { %142 = vadd.xlane.f32.xlu2 %v290_v27  ;;  %v292_v34 = vpop.eup %291 }
 0x128   :  { %v210_v63 = vmul.f32 %v288_v57, %v209_v60  ;;  %v106_v36 = vmul.f32 %v292_v34, %v104_v32 }
 0x12a   :  { %v211_v4 = vmul.f32 0.5, %v210_v63  ;;  %v107_v38 = vmul.f32 %v292_v34, %v106_v36 }
 0x12c   :  { %v212_v7 = vsub.f32 1.5, %v211_v4  ;;  %v108_v40 = vmul.f32 0.5, %v107_v38 }
 0x12e   :  { %v213_v11 = vmul.f32 %v288_v57, %v212_v7  ;;  %v109_v42 = vsub.f32 1.5, %v108_v40 }
 0x130   :  { %v214_v13 = vmul.f32 %v213_v11, %v207_v53  ;;  %v110_v44 = vmul.f32 %v292_v34, %v109_v42 }
 0x132   :  { %v216_v16 = vsel %vm215_vm13, %v207_v53, %v214_v13  ;;  %v111_v46 = vmul.f32 %v110_v44, %v104_v32 }
 0x133   :  { %v219_v2 = vsel %vm217_vm15, %v218_v14, %v216_v16 }
 0x134   :  { %v230_v8 = vsel %vm226_vm14, %v219_v2, -inf  ;;  %v225_v20 = vsel %vm224_vm4, %v219_v2, 0.0  ;;  %v113_v50 = vsel %vm112_vm3, %v104_v32, %v111_v46 }
 0x135   :  { %231 = vmax.xlane.f32.xlu0 %v230_v8  ;;  %v227_v21 = vsel %vm226_vm14, %v225_v20, -inf  ;;  %v116_v53 = vsel %vm114_vm7, %v115_v48, %v113_v50 }
 0x13d   :  { %118 = vadd.xlane.f32.xlu0 %v117_v19 }
 0x145   :  { %228 = vmax.xlane.f32.xlu0 %v227_v21 }
 0x14d   :  { %153 = vadd.xlane.f32.xlu0 %v152_v26 }
 0x19a   :  { %v143_v47 = vpop.xlane.xlu2 %142 }
 0x1a8   :  { %v232_v28 = vpop.xlane.xlu0 %231 }
 0x1a9   :  { %v233_v29 = vadd.f32 %v232_v28, %v219_v2 }
 0x1ab   :  { %v234_v30 = vsel %vm222_vm2, %v233_v29, %v219_v2 }
 0x1ac   :  { %v235_v31 = vsel %vm226_vm14, %v234_v30, inf }
 0x1ad   :  { %236 = vmin.xlane.f32.xlu2 %v235_v31 }
 0x1b0   :  { %v119_v33 = vpop.xlane.xlu0 %118 }
 0x1b1   :  { %293 = vrsqrt.f32 %v119_v33  ;;  %vm127_vm6 = vcmp.eq.f32.partialorder %v119_v33, inf  ;;  %v130_v49 = vand.u32 2147483648, %v119_v33  ;;  %vm129_vm8 = vcmp.eq.f32.partialorder %v119_v33, 0.0 }
 0x1b2   :  { %295 = vlog2.f32 %v143_v47 }
 0x1b7   :  { %v294_v35 = vpop.eup %293 }
 0x1b8   :  { %v121_v22 = vmul.f32 %v294_v35, %v119_v33  ;;  %v229_v52 = vpop.xlane.xlu0 %228  ;;  %v296_v55 = vpop.eup %295 }
 0x1b9   :  { %v145_v58 = vmul.f32 0.6931472, %v296_v55 }
 0x1ba   :  { %v122_v37 = vmul.f32 %v294_v35, %v121_v22 }
 0x1bc   :  { %v123_v39 = vmul.f32 0.5, %v122_v37 }
 0x1be   :  { %v124_v41 = vsub.f32 1.5, %v123_v39 }
 0x1c0   :  { %v125_v43 = vmul.f32 %v294_v35, %v124_v41  ;;  %v154_v60 = vpop.xlane.xlu0 %153 }
 0x1c1   :  { %v155_v63 = vsub.f32 %v145_v58, %v154_v60 }
 0x1c2   :  { %v126_v45 = vmul.f32 %v125_v43, %v119_v33 }
 0x1c4   :  { %v128_v51 = vsel %vm127_vm6, %v119_v33, %v126_v45 }
 0x1c5   :  { %v131_v54 = vsel %vm129_vm8, %v130_v49, %v128_v51 }
 0x1c6   :  { %v132_v56 = vsub.f32 %v116_v53, %v131_v54 }
 0x1c8   :  { %v133_v61 = vadd.f32 1.0, %v132_v56 }
 0x1ca   :  { %v134_v1 = vmax.f32 %v133_v61, 0.0 }
 0x220   :  { %v237_v57 = vpop.xlane.xlu2 %236 }
 0x221   :  { %v238_v59 = vsub.f32 %v229_v52, %v237_v57 }
 0x223   :  { %v239_v62 = vadd.f32 1.0, %v238_v59 }
 0x225   :  { %v240_v0 = vmax.f32 %v239_v62, 0.0 }
 0x227   :  { %v241_v4 = vadd.f32 %v240_v0, %v155_v63 }
 0x229   :  { %v242_v5 = vadd.f32 %v241_v4, %v134_v1 }
 0x22b   :  { %v243_v6 = vrot.slane %v242_v5, 4 }
 0x22d   :  { %v244_v7 = vadd.f32 %v243_v6, %v242_v5 }
 0x22f   :  { %v245_v9 = vrot.slane %v244_v7, 2 }
 0x231   :  { %v246_v10 = vadd.f32 %v245_v9, %v244_v7 }
 0x233   :  { %v247_v11 = vrot.slane %v246_v10, 1 }
 0x235   :  { %v248_v12 = vadd.f32 %v247_v11, %v246_v10 }
 0x237   :  { %v249_v13 = vmul.f32 0.125, %v248_v12 }
 0x239   :  { %251 = vst.msk [vmem:[#allocation5] sm:$0x1] %vm250_vm9, %v249_v13 }
 0x23a   :  { %262 = dma.vmem_to_hbm [thread:$0]  %s258_s25, 16, %s260_s28, [#allocation4]  }
 0x23b   :  { %347 = dma.done.wait [#allocation4], 16  }
 0x23c   :  { %348 = vsyncadd [#allocation4], 4294967280 }
 0x23d   :  { %267 = vsyncpa [#allocation3], 1 }
 0x23e   :  { %268 = vsyncpa [#allocation4], 1 }

</bundles_post_ra>
